<compile_context>
chip_gen: v5e
topology: v5e:2x2
jax: 0.10.0
libtpu: 0.0.40
codegen_flags: <defaults>
</compile_context>

<pallas_src>
import functools

import jax
import jax.numpy as jnp
from jax.experimental import pallas as pl
from jax.experimental.pallas import tpu as pltpu


_LANE = 128
_SUBLANE = 8
_MAX_TILE_ROWS = 1024  # 1024 x 128 x 4 B = 512 KiB per f32 block


def _ema_kernel(decay_ref, param_ref, ema_ref, out_ref):
    # decay_ref: (1,) f32 in SMEM; param/ema/out: (tile_rows, 128) VMEM tiles.
    d = decay_ref[0]
    p = param_ref[...].astype(jnp.float32)
    s = ema_ref[...].astype(jnp.float32)
    out_ref[...] = ((1.0 - d) * p + d * s).astype(out_ref.dtype)


def _round_up(x, m):
    return ((x + m - 1) // m) * m


def _slab_geometry(total_elems):
    """Rows (multiple of tile_rows) and tile_rows for a flat slab of `total_elems`."""
    rows_min = max(_SUBLANE, _round_up(pl.cdiv(total_elems, _LANE), _SUBLANE))
    tile_rows = min(_MAX_TILE_ROWS, rows_min)
    rows = _round_up(rows_min, tile_rows)
    return rows, tile_rows


def _build_update_fn(rows, tile_rows, pad, dtype):
    """Jitted fused EMA step: (decay, flat params tuple, shadow slab) -> new slab."""
    grid = (rows // tile_rows,)

    ema_call = pl.pallas_call(
        _ema_kernel,
        out_shape=jax.ShapeDtypeStruct((rows, _LANE), dtype),
        grid=grid,
        in_specs=[
            pl.BlockSpec(memory_space=pltpu.SMEM),                 # decay scalar
            pl.BlockSpec((tile_rows, _LANE), lambda i: (i, 0)),    # param slab
            pl.BlockSpec((tile_rows, _LANE), lambda i: (i, 0)),    # shadow slab
        ],
        out_specs=pl.BlockSpec((tile_rows, _LANE), lambda i: (i, 0)),
        input_output_aliases={2: 0},                               # shadow updated in place
        compiler_params=pltpu.CompilerParams(
            dimension_semantics=("parallel",),
        ),
    )

    @functools.partial(jax.jit, donate_argnums=(2,))
    def update(decay, flat_params, ema_slab):
        parts = list(flat_params)
        if pad:
            parts.append(jnp.zeros((pad,), dtype))
        param_slab = jnp.concatenate(parts).reshape(rows, _LANE)
        d = jnp.asarray(decay, jnp.float32).reshape(1)
        return ema_call(d, param_slab, ema_slab)

    return update


class EMA:
    """JAX/Pallas port of cflearn's EMA module (forward pass only).

    Shadow buffers for all tracked parameters are kept fused in a single
    lane-dense slab; `forward()` updates the whole slab with one kernel call.
    """

    def __init__(self, decay, named_parameters, *, use_num_updates=False):
        self._decay = float(decay)
        # mimic name mangling `.` -> `_` from the PyTorch module
        self._names = [name.replace(".", "_") for name, _ in named_parameters]
        self._params = {
            name.replace(".", "_"): jnp.asarray(p) for name, p in named_parameters
        }

        dtypes = {self._params[n].dtype for n in self._names}
        assert len(dtypes) == 1, "EMA Pallas port assumes a single parameter dtype"
        self._dtype = dtypes.pop()

        self._shapes = {n: tuple(self._params[n].shape) for n in self._names}
        self._sizes = {n: int(self._params[n].size) for n in self._names}
        self._offsets = {}
        off = 0
        for n in self._names:
            self._offsets[n] = off
            off += self._sizes[n]
        total = off

        rows, tile_rows = _slab_geometry(total)
        self._rows = rows
        self._pad = rows * _LANE - total

        # register_buffer(name, param.data.clone()) -> fused lane-dense slab.
        parts = [self._params[n].ravel() for n in self._names]
        if self._pad:
            parts.append(jnp.zeros((self._pad,), self._dtype))
        self._shadow_slab = jnp.concatenate(parts).reshape(rows, _LANE)

        self._update = _build_update_fn(rows, tile_rows, self._pad, self._dtype)

        self.num_updates = 0 if use_num_updates else -1
        self.training = True

    @property
    def shadow(self):
        """Per-parameter views of the fused shadow slab (original shapes)."""
        flat = self._shadow_slab.reshape(-1)
        return {
            n: flat[self._offsets[n] : self._offsets[n] + self._sizes[n]].reshape(
                self._shapes[n]
            )
            for n in self._names
        }

    def forward(self):
        if not self.training:
            raise ValueError("should not update `EMA` at inference stage")
        if self.num_updates < 0:
            decay = self._decay
        else:
            self.num_updates += 1
            decay = min(self._decay, (1 + self.num_updates) / (10 + self.num_updates))
        flat_params = tuple(self._params[n].ravel() for n in self._names)
        # One fused, pipelined, in-place (aliased + donated) kernel call.
        self._shadow_slab = self._update(decay, flat_params, self._shadow_slab)

    __call__ = forward


if __name__ == "__main__":
    key = jax.random.PRNGKey(0)
    k1, k2, k3, k4, k5 = jax.random.split(key, 5)

    # Deterministic synthetic "named parameters" (shapes typical of a small net):
    # a conv weight (OIHW), a conv bias, a linear weight, a linear bias.
    named_params = [
        ("conv.weight", jax.random.normal(k1, (4, 4, 3, 3), dtype=jnp.float32)),
        ("conv.bias", jax.random.normal(k2, (4,), dtype=jnp.float32)),
        ("linear.weight", jax.random.normal(k3, (32, 16), dtype=jnp.float32)),
        ("linear.bias", jax.random.normal(k4, (32,), dtype=jnp.float32)),
    ]

    ema = EMA(0.9, named_params, use_num_updates=True)

    # Simulate a parameter update, then run the EMA forward pass (kernel).
    for name in ema._names:
        kk, k5 = jax.random.split(k5)
        ema._params[name] = ema._params[name] + 0.1 * jax.random.normal(
            kk, ema._params[name].shape, dtype=jnp.float32
        )

    # Run two EMA updates (second one exercises num_updates-dependent decay).
    ema.forward()
    ema.forward()

    shadow = ema.shadow
    for v in shadow.values():
        jax.block_until_ready(v)

    # Pure-JAX reference replay.
    ref_shadow = {name.replace(".", "_"): jnp.asarray(p) for name, p in named_params}
    ref_params = dict(ema._params)
    n_upd = 0
    for _ in range(2):
        n_upd += 1
        d = min(0.9, (1 + n_upd) / (10 + n_upd))
        for name in ref_shadow:
            ref_shadow[name] = (1.0 - d) * ref_params[name] + d * ref_shadow[name]

    ok = True
    for name in ref_shadow:
        if not jnp.allclose(ref_shadow[name], shadow[name], atol=1e-5, rtol=1e-5):
            ok = False
            print(f"MISMATCH in {name}")

    if ok:
        print("KERNEL_OK")
</pallas_src>

<mosaic_0001>
module attributes {stable_mosaic.version = 11 : i64} {
  func.func @_ema_kernel(%arg0: i32, %arg1: memref<1xf32, #tpu.memory_space<smem>>, %arg2: memref<8x128xf32, #tpu.memory_space<vmem>>, %arg3: memref<8x128xf32, #tpu.memory_space<vmem>>, %arg4: memref<8x128xf32, #tpu.memory_space<vmem>>) attributes {dimension_semantics = [#tpu.dimension_semantics<parallel>], iteration_bounds = array<i64: 1>, scalar_prefetch = 0 : i64, scratch_operands = 0 : i64, tpu.core_type = #tpu.core_type<tc>, window_params = [{transform_indices = @transform_0, window_bounds = array<i64: 1>}, {transform_indices = @transform_1, window_bounds = array<i64: 8, 128>}, {transform_indices = @transform_2, window_bounds = array<i64: 8, 128>}, {transform_indices = @transform_3, window_bounds = array<i64: 8, 128>}]} {
    %c0 = arith.constant 0 : index
    %0 = memref.load %arg1[%c0] : memref<1xf32, #tpu.memory_space<smem>>
    %c0_0 = arith.constant 0 : index
    %c0_1 = arith.constant 0 : index
    %1 = vector.load %arg2[%c0_0, %c0_1] : memref<8x128xf32, #tpu.memory_space<vmem>>, vector<8x128xf32>
    %c0_2 = arith.constant 0 : index
    %c0_3 = arith.constant 0 : index
    %2 = vector.load %arg3[%c0_2, %c0_3] : memref<8x128xf32, #tpu.memory_space<vmem>>, vector<8x128xf32>
    %cst = arith.constant 1.000000e+00 : f32
    %3 = arith.subf %cst, %0 : f32
    %4 = vector.broadcast %3 : f32 to vector<8x128xf32>
    %5 = arith.mulf %4, %1 : vector<8x128xf32>
    %6 = vector.broadcast %0 : f32 to vector<8x128xf32>
    %7 = arith.mulf %6, %2 : vector<8x128xf32>
    %8 = arith.addf %5, %7 : vector<8x128xf32>
    %c0_4 = arith.constant 0 : index
    %c0_5 = arith.constant 0 : index
    %9 = vector.load %arg4[%c0_4, %c0_5] : memref<8x128xf32, #tpu.memory_space<vmem>>, vector<8x128xf32>
    tpu.vector_store %arg4[%c0_4, %c0_5], %8 {strides = array<i32>} : memref<8x128xf32, #tpu.memory_space<vmem>>, vector<8x128xf32>,
    return
  }
  func.func @transform_0(%arg0: i32) -> i32 {
    %c0_i32 = arith.constant 0 : i32
    %c0_i32_0 = arith.constant 0 : i32
    return %c0_i32 : i32
  }
  func.func @transform_1(%arg0: i32) -> (i32, i32) {
    %c0_i32 = arith.constant 0 : i32
    %c0_i32_0 = arith.constant 0 : i32
    return %arg0, %c0_i32 : i32, i32
  }
  func.func @transform_2(%arg0: i32) -> (i32, i32) {
    %c0_i32 = arith.constant 0 : i32
    %c0_i32_0 = arith.constant 0 : i32
    return %arg0, %c0_i32 : i32, i32
  }
  func.func @transform_3(%arg0: i32) -> (i32, i32) {
    %c0_i32 = arith.constant 0 : i32
    %c0_i32_0 = arith.constant 0 : i32
    return %arg0, %c0_i32 : i32, i32
  }
}

</mosaic_0001>

<bundles_post_ra>
// kernel: update.1
= control target key start
LH: loop header
LB: loop body
LE: loop exit
PB: predicated region body
PF: predicated region fallthrough
CT: control target
= control target key end

     0   :  { %9 = vsyncpa [#allocation4], 0  ;;  %s148_s0 = inlined_call_operand.<no memory space> [shape: f32[1], index: 0, kind: input, shape index: {}]   ;;  %s149_s1 = inlined_call_operand.vmem [shape: f32[8,128], index: 1, kind: input, shape index: {}]   ;;  %s150_s2 = inlined_call_operand.hbm [shape: f32[8,128], index: 2, kind: input, shape index: {}, may-alias: {2,3}]   ;;  %s151_s3 = inlined_call_operand.hbm [shape: f32[8,128], index: 3, kind: output, shape index: {}, may-alias: {2,3}]  }
   0x1   :  { %10 = vsyncpa [#allocation5], 0  ;;  %s20_s14 = sshll.u32 %s150_s2, 4  ;;  %s111_s15 = smov [#allocation3]   ;;  %s21_s14 = int_to_ptr.hbm [resolvable:$true] %s20_s14 }
   0x2   :  { %s22_s16 = sshll.u32 %s111_s15, 4  ;;  %s23_s16 = int_to_ptr.vmem [resolvable:$true] %s22_s16 }
   0x3   :  { %25 = dma.hbm_to_vmem [thread:$0]  %s21_s14, 128, %s23_s16, [#allocation4]  }
   0x4   :  { %107 = dma.done.wait [#allocation4], 128  }
   0x5   :  { %108 = vsyncadd [#allocation4], 4294967168  ;;  %s33_s19 = ssub.f32 1.0, %s148_s0  ;;  %v36_v1 = vstv %s148_s0  ;;  %v31_v2 = vld [vmem:[%s149_s1] sm:$0xff]  ;;  %s112_s2 = smov [#allocation6]  }
   0x6   :  { %v32_v3 = vld [vmem:[#allocation3] sm:$0xff]  ;;  %s45_s24 = sshll.u32 %s112_s2, 4  ;;  %s47_s27 = sshll.u32 %s151_s3, 4  ;;  %s46_s24 = int_to_ptr.vmem [resolvable:$true] %s45_s24  ;;  %s48_s27 = int_to_ptr.hbm [resolvable:$true] %s47_s27 }
   0x7   :  { %v34_v0 = vstv %s33_s19  ;;  %v37_v5 = vmul.f32 %v36_v1, %v32_v3 }
   0x8   :  { %v35_v4 = vmul.f32 %v34_v0, %v31_v2 }
   0xa   :  { %v38_v6 = vadd.f32 %v37_v5, %v35_v4 }
   0xc   :  { %39 = vst [vmem:[#allocation6] sm:$0xff] %v38_v6 }
   0xd   :  { %50 = dma.vmem_to_hbm [thread:$0]  %s46_s24, 128, %s48_s27, [#allocation5]  }
   0xe   :  { %109 = dma.done.wait [#allocation5], 128  }
   0xf   :  { %110 = vsyncadd [#allocation5], 4294967168 }
  0x10   :  { %55 = vsyncpa [#allocation4], 1 }
  0x11   :  { %56 = vsyncpa [#allocation5], 1 }

</bundles_post_ra>
